<compile_context>
chip_gen: v5e
topology: v5e:2x2
jax: 0.10.0
libtpu: 0.0.40
codegen_flags: <defaults>
</compile_context>

<pallas_src>
import jax
import jax.numpy as jnp
from jax.experimental import pallas as pl
from jax.experimental.pallas import tpu as pltpu


_LANES = 128


def _normalize_kernel(scale_ref, bias_ref, x_ref, o_ref):
    # scale/bias: (block_nc, 1, 128) f32, broadcast along sublanes.
    # x/o: (block_nc, block_rows, 128) lane-dense tiles.
    y = x_ref[...] * scale_ref[...] + bias_ref[...]
    o_ref[...] = y.astype(o_ref.dtype)


def _chip_defaults():
    """Return (target_block_rows, vmem_limit_bytes) tuned per TPU generation."""
    try:
        kind = jax.devices()[0].device_kind.lower()
    except Exception:
        kind = ""
    if "v7" in kind:
        # 8192 rows * 128 lanes * 4 B = 4 MiB tile; double-buffered in+out is
        # 16 MiB -> above the 32 MiB scoped default? no, but raise the limit so
        # there is headroom on v7x's 64 MiB physical VMEM.
        return 8192, 48 << 20
    if "v6" in kind:
        # 2 MiB tiles; 2 bufs x (in+out) = 8 MiB fits the 32 MiB scoped default.
        return 4096, None
    # v5e (16 MiB scoped default) and unknown chips: 1 MiB tiles.
    return 2048, None


def normalize(x, mean, std):
    """(x - mean[c]) / std[c] over channel axis 1 of an (N, C, ...) input."""
    N, C = x.shape[0], x.shape[1]
    S = 1
    for d in x.shape[2:]:
        S *= d
    NC = N * C
    itemsize = jnp.dtype(x.dtype).itemsize

    target_rows, vmem_limit = _chip_defaults()

    # Fold normalization into an FMA: out = x * (1/std) + (-mean/std).
    mean_f = mean.astype(jnp.float32)
    std_f = std.astype(jnp.float32)
    scale = 1.0 / std_f
    bias = -mean_f / std_f
    # (NC, 1, 128): lane-replicated so the in-kernel broadcast is sublane-only.
    scale_nc = jnp.broadcast_to(jnp.tile(scale, N)[:, None, None], (NC, 1, _LANES))
    bias_nc = jnp.broadcast_to(jnp.tile(bias, N)[:, None, None], (NC, 1, _LANES))

    # Lane-dense layout: (NC, rows_total, 128). Pad only to the next multiple
    # of 128 and only when needed; fast path is a pure reshape (no HBM pass).
    rows_total = pl.cdiv(S, _LANES)
    s_lane = rows_total * _LANES
    needs_pad = s_lane != S

    xf = x.reshape(NC, S)
    if needs_pad:
        xf = jnp.pad(xf, ((0, 0), (0, s_lane - S)))
    xf = xf.reshape(NC, rows_total, _LANES)

    if rows_total > target_rows:
        # Big spatial: tile rows (multiple of 16 -> fine for f32 and bf16);
        # Pallas masks the ragged last row tile.
        block_rows = target_rows
        block_nc = 1
    else:
        # Small spatial: take the whole row axis (full-dim, exempt from the /8
        # rule) and fuse channels so each tile is ~target_rows*128*4 bytes.
        block_rows = rows_total
        target_bytes = target_rows * _LANES * 4
        per_chan_bytes = max(1, rows_total * _LANES * itemsize)
        block_nc = int(max(1, min(NC, target_bytes // per_chan_bytes)))

    grid_rows = pl.cdiv(rows_total, block_rows)
    grid_nc = pl.cdiv(NC, block_nc)

    # Put the longer axis first so megacore / v7x 2-TC sharding splits evenly.
    if grid_rows >= grid_nc:
        grid = (grid_rows, grid_nc)
        x_map = lambda r, c: (c, r, 0)
        sb_map = lambda r, c: (c, 0, 0)
    else:
        grid = (grid_nc, grid_rows)
        x_map = lambda c, r: (c, r, 0)
        sb_map = lambda c, r: (c, 0, 0)

    cost = pl.CostEstimate(
        flops=2 * NC * S,
        transcendentals=0,
        bytes_accessed=2 * NC * s_lane * itemsize + 2 * NC * _LANES * 4,
    )

    out = pl.pallas_call(
        _normalize_kernel,
        out_shape=jax.ShapeDtypeStruct((NC, rows_total, _LANES), x.dtype),
        grid=grid,
        in_specs=[
            pl.BlockSpec((block_nc, 1, _LANES), sb_map),        # scale
            pl.BlockSpec((block_nc, 1, _LANES), sb_map),        # bias
            pl.BlockSpec((block_nc, block_rows, _LANES), x_map),  # x
        ],
        out_specs=pl.BlockSpec((block_nc, block_rows, _LANES), x_map),
        compiler_params=pltpu.CompilerParams(
            dimension_semantics=("parallel", "parallel"),
            vmem_limit_bytes=vmem_limit,
        ),
        cost_estimate=cost,
    )(scale_nc, bias_nc, xf)

    if needs_pad:
        return out.reshape(NC, s_lane)[:, :S].reshape(x.shape)
    return out.reshape(x.shape)


if __name__ == "__main__":
    # Deterministic parameters (same defaults as the PyTorch module).
    mean = jnp.array([0.485, 0.456, 0.406], dtype=jnp.float32)
    std = jnp.array([0.229, 0.224, 0.225], dtype=jnp.float32)
    mean5 = mean.reshape(1, -1, 1, 1, 1)
    std5 = std.reshape(1, -1, 1, 1, 1)

    key = jax.random.PRNGKey(0)

    # 1) Fast path: S = 4*16*16 = 1024 (multiple of 128) -> no pad / no slice.
    x = jax.random.normal(key, (2, 3, 4, 16, 16), dtype=jnp.float32)
    out = jax.block_until_ready(normalize(x, mean, std))
    ref = (x - mean5) / std5
    assert out.shape == x.shape and out.dtype == x.dtype
    assert jnp.allclose(out, ref, atol=1e-5, rtol=1e-5)

    # 2) Ragged path: S = 2*7*9 = 126 (not a multiple of 128) -> minimal pad.
    x2 = jax.random.normal(jax.random.PRNGKey(1), (1, 3, 2, 7, 9), dtype=jnp.float32)
    out2 = jax.block_until_ready(normalize(x2, mean, std))
    ref2 = (x2 - mean5) / std5
    assert out2.shape == x2.shape
    assert jnp.allclose(out2, ref2, atol=1e-5, rtol=1e-5)

    # 3) bf16 path: cast-on-store, loose tolerance.
    x3 = x.astype(jnp.bfloat16)
    out3 = jax.block_until_ready(normalize(x3, mean, std))
    ref3 = (x3.astype(jnp.float32) - mean5) / std5
    assert out3.shape == x3.shape and out3.dtype == jnp.bfloat16
    assert jnp.allclose(out3.astype(jnp.float32), ref3, atol=5e-2, rtol=5e-2)

    print("KERNEL_OK")
</pallas_src>

<mosaic_0001>
module attributes {stable_mosaic.version = 11 : i64} {
  func.func @_normalize_kernel(%arg0: i32, %arg1: i32, %arg2: memref<6x1x128xf32, #tpu.memory_space<vmem>>, %arg3: memref<6x1x128xf32, #tpu.memory_space<vmem>>, %arg4: memref<6x8x128xf32, #tpu.memory_space<vmem>>, %arg5: memref<6x8x128xf32, #tpu.memory_space<vmem>>) attributes {dimension_semantics = [#tpu.dimension_semantics<parallel>, #tpu.dimension_semantics<parallel>], iteration_bounds = array<i64: 1, 1>, scalar_prefetch = 0 : i64, scratch_operands = 0 : i64, tpu.core_type = #tpu.core_type<tc>, window_params = [{transform_indices = @transform_0, window_bounds = array<i64: 6, 1, 128>}, {transform_indices = @transform_1, window_bounds = array<i64: 6, 1, 128>}, {transform_indices = @transform_2, window_bounds = array<i64: 6, 8, 128>}, {transform_indices = @transform_3, window_bounds = array<i64: 6, 8, 128>}]} {
    %c0 = arith.constant 0 : index
    %c0_0 = arith.constant 0 : index
    %c0_1 = arith.constant 0 : index
    %0 = vector.load %arg4[%c0, %c0_0, %c0_1] : memref<6x8x128xf32, #tpu.memory_space<vmem>>, vector<6x8x128xf32>
    %c0_2 = arith.constant 0 : index
    %c0_3 = arith.constant 0 : index
    %c0_4 = arith.constant 0 : index
    %1 = vector.load %arg2[%c0_2, %c0_3, %c0_4] : memref<6x1x128xf32, #tpu.memory_space<vmem>>, vector<6x1x128xf32>
    %2 = vector.broadcast %1 : vector<6x1x128xf32> to vector<6x8x128xf32>
    %3 = arith.mulf %0, %2 : vector<6x8x128xf32>
    %c0_5 = arith.constant 0 : index
    %c0_6 = arith.constant 0 : index
    %c0_7 = arith.constant 0 : index
    %4 = vector.load %arg3[%c0_5, %c0_6, %c0_7] : memref<6x1x128xf32, #tpu.memory_space<vmem>>, vector<6x1x128xf32>
    %5 = vector.broadcast %4 : vector<6x1x128xf32> to vector<6x8x128xf32>
    %6 = arith.addf %3, %5 : vector<6x8x128xf32>
    %c0_8 = arith.constant 0 : index
    %c0_9 = arith.constant 0 : index
    %c0_10 = arith.constant 0 : index
    %7 = vector.load %arg5[%c0_8, %c0_9, %c0_10] : memref<6x8x128xf32, #tpu.memory_space<vmem>>, vector<6x8x128xf32>
    tpu.vector_store %arg5[%c0_8, %c0_9, %c0_10], %6 {strides = array<i32>} : memref<6x8x128xf32, #tpu.memory_space<vmem>>, vector<6x8x128xf32>,
    return
  }
  func.func @transform_0(%arg0: i32, %arg1: i32) -> (i32, i32, i32) {
    %c0_i32 = arith.constant 0 : i32
    %c0_i32_0 = arith.constant 0 : i32
    %c0_i32_1 = arith.constant 0 : i32
    return %arg1, %c0_i32, %c0_i32_0 : i32, i32, i32
  }
  func.func @transform_1(%arg0: i32, %arg1: i32) -> (i32, i32, i32) {
    %c0_i32 = arith.constant 0 : i32
    %c0_i32_0 = arith.constant 0 : i32
    %c0_i32_1 = arith.constant 0 : i32
    return %arg1, %c0_i32, %c0_i32_0 : i32, i32, i32
  }
  func.func @transform_2(%arg0: i32, %arg1: i32) -> (i32, i32, i32) {
    %c0_i32 = arith.constant 0 : i32
    %c0_i32_0 = arith.constant 0 : i32
    return %arg1, %arg0, %c0_i32 : i32, i32, i32
  }
  func.func @transform_3(%arg0: i32, %arg1: i32) -> (i32, i32, i32) {
    %c0_i32 = arith.constant 0 : i32
    %c0_i32_0 = arith.constant 0 : i32
    return %arg1, %arg0, %c0_i32 : i32, i32, i32
  }
}

</mosaic_0001>

<bundles_post_ra>
// kernel: tpu_custom_call.1
= control target key start
LH: loop header
LB: loop body
LE: loop exit
PB: predicated region body
PF: predicated region fallthrough
CT: control target
= control target key end

     0   :  { %8 = vsyncpa [#allocation3], 0  ;;  %s322_s0 = inlined_call_operand.hbm [shape: f32[6,1,128], index: 0, kind: input, shape index: {}]   ;;  %s323_s1 = inlined_call_operand.hbm [shape: f32[6,1,128], index: 1, kind: input, shape index: {}]   ;;  %s324_s2 = inlined_call_operand.hbm [shape: f32[6,8,128], index: 2, kind: input, shape index: {}]   ;;  %s325_s3 = inlined_call_operand.hbm [shape: f32[6,8,128], index: 3, kind: output, shape index: {}]  }
   0x1   :  { %9 = vsyncpa [#allocation6], 0 }
   0x2   :  { %10 = vsyncpa [#allocation4], 0  ;;  %s28_s14 = sshll.u32 %s323_s1, 4  ;;  %s276_s15 = smov [#allocation5]   ;;  %s29_s14 = int_to_ptr.hbm [resolvable:$true] %s28_s14 }
   0x3   :  { %s30_s16 = sshll.u32 %s276_s15, 4  ;;  %s15_s19 = sshll.u32 %s322_s0, 4  ;;  %s31_s16 = int_to_ptr.vmem [resolvable:$true] %s30_s16  ;;  %s16_s19 = int_to_ptr.hbm [resolvable:$true] %s15_s19 }
   0x4   :  { %s277_s20 = smov 16   ;;  %s278_s21 = smov 1  }
   0x5   :  { %36 = dma.hbm_to_vmem [thread:$0]  %s29_s14, 96, %s31_s16, [#allocation6], %s277_s20, %s277_s20, %s278_s21  }
   0x6   :  { %s279_s22 = smov [#allocation2]   ;;  %s41_s26 = sshll.u32 %s324_s2, 4  ;;  %s42_s26 = int_to_ptr.hbm [resolvable:$true] %s41_s26 }
   0x7   :  { %s17_s23 = sshll.u32 %s279_s22, 4  ;;  %s280_s1 = smov [#allocation7]   ;;  %s18_s23 = int_to_ptr.vmem [resolvable:$true] %s17_s23 }
   0x8   :  { %23 = dma.hbm_to_vmem [thread:$0]  %s16_s19, 96, %s18_s23, [#allocation3], %s277_s20, %s277_s20, %s278_s21  }
   0x9   :  { %s43_s27 = sshll.u32 %s280_s1, 4  ;;  %s281_s28 = smov 128   ;;  %s44_s27 = int_to_ptr.vmem [resolvable:$true] %s43_s27 }
   0xa   :  { %s282_s29 = smov 8  }
   0xb   :  { %49 = dma.hbm_to_vmem [thread:$0]  %s42_s26, 768, %s44_s27, [#allocation6], %s281_s28, %s281_s28, %s282_s29  }
   0xc   :  { %270 = dma.done.wait [#allocation3], 96  }
   0xd   :  { %271 = vsyncadd [#allocation3], 4294967200 }
   0xe   :  { %272 = dma.done.wait [#allocation6], 864  }
   0xf   :  { %273 = vsyncadd [#allocation6], 4294966432  ;;  %v62_v0 = vld [vmem:[#allocation7] sm:$0xff]  ;;  %v162_v1 = vld [vmem:[#allocation2] ss:$0 sm:$0xff]  ;;  %s283_s0 = smov [#allocation8]  }
  0x10   :  { %v163_v2 = vld [vmem:[#allocation5] ss:$0 sm:$0xff]  ;;  %v63_v3 = vld [vmem:[#allocation7 + $0x8] sm:$0xff]  ;;  %v92_v4 = vmul.f32 %v162_v1, %v62_v0  ;;  %v164_v5 = vld [vmem:[#allocation2 + $0x1] ss:$0 sm:$0xff]  ;;  %s138_s2 = sshll.u32 %s283_s0, 4  ;;  %s139_s2 = int_to_ptr.vmem [resolvable:$true] %s138_s2 }
  0x11   :  { %v165_v6 = vld [vmem:[#allocation5 + $0x1] ss:$0 sm:$0xff]  ;;  %v64_v7 = vld [vmem:[#allocation7 + $0x10] sm:$0xff]  ;;  %v93_v9 = vmul.f32 %v164_v5, %v63_v3  ;;  %v167_v11 = vld [vmem:[#allocation5 + $0x2] ss:$0 sm:$0xff]  ;;  %s140_s5 = sshll.u32 %s325_s3, 4  ;;  %s141_s5 = int_to_ptr.hbm [resolvable:$true] %s140_s5 }
  0x12   :  { %v122_v8 = vadd.f32 %v163_v2, %v92_v4  ;;  %v166_v10 = vld [vmem:[#allocation2 + $0x2] ss:$0 sm:$0xff]  ;;  %v65_v12 = vld [vmem:[#allocation7 + $0x18] sm:$0xff]  ;;  %v168_v13 = vld [vmem:[#allocation2 + $0x3] ss:$0 sm:$0xff] }
  0x13   :  { %v123_v14 = vadd.f32 %v165_v6, %v93_v9  ;;  %v94_v15 = vmul.f32 %v166_v10, %v64_v7  ;;  %v169_v16 = vld [vmem:[#allocation5 + $0x3] ss:$0 sm:$0xff]  ;;  %v66_v17 = vld [vmem:[#allocation7 + $0x20] sm:$0xff]  ;;  %v95_v18 = vmul.f32 %v168_v13, %v65_v12  ;;  %v170_v19 = vld [vmem:[#allocation2 + $0x4] ss:$0 sm:$0xff] }
  0x14   :  { %128 = vst [vmem:[#allocation8] sm:$0xff] %v122_v8  ;;  %v171_v21 = vld [vmem:[#allocation5 + $0x4] ss:$0 sm:$0xff]  ;;  %v67_v22 = vld [vmem:[#allocation7 + $0x28] sm:$0xff]  ;;  %v96_v24 = vmul.f32 %v170_v19, %v66_v17  ;;  %v172_v25 = vld [vmem:[#allocation2 + $0x5] ss:$0 sm:$0xff] }
  0x15   :  { %129 = vst [vmem:[#allocation8 + $0x8] sm:$0xff] %v123_v14  ;;  %v124_v20 = vadd.f32 %v167_v11, %v94_v15  ;;  %v125_v23 = vadd.f32 %v169_v16, %v95_v18  ;;  %v173_v26 = vld [vmem:[#allocation5 + $0x5] ss:$0 sm:$0xff]  ;;  %v97_v28 = vmul.f32 %v172_v25, %v67_v22 }
  0x16   :  { %v126_v27 = vadd.f32 %v171_v21, %v96_v24 }
  0x17   :  { %130 = vst [vmem:[#allocation8 + $0x10] sm:$0xff] %v124_v20  ;;  %v127_v29 = vadd.f32 %v173_v26, %v97_v28 }
  0x18   :  { %131 = vst [vmem:[#allocation8 + $0x18] sm:$0xff] %v125_v23 }
  0x19   :  { %132 = vst [vmem:[#allocation8 + $0x20] sm:$0xff] %v126_v27 }
  0x1a   :  { %133 = vst [vmem:[#allocation8 + $0x28] sm:$0xff] %v127_v29 }
  0x1b   :  { %146 = dma.vmem_to_hbm [thread:$0]  %s139_s2, 768, %s141_s5, [#allocation4], %s281_s28, %s281_s28, %s282_s29  }
  0x1c   :  { %274 = dma.done.wait [#allocation4], 768  }
  0x1d   :  { %275 = vsyncadd [#allocation4], 4294966528 }
  0x1e   :  { %151 = vsyncpa [#allocation3], 1 }
  0x1f   :  { %152 = vsyncpa [#allocation6], 1 }
  0x20   :  { %153 = vsyncpa [#allocation4], 1 }

</bundles_post_ra>
